<compile_context>
chip_gen: v6e
topology: v6e:2x2x1
jax: 0.10.0
libtpu: 0.0.40
codegen_flags: <defaults>
</compile_context>

<pallas_src>
import math
import functools

import jax
import jax.numpy as jnp
from jax.experimental import pallas as pl
from jax.experimental.pallas import tpu as pltpu


def _round_up(x, m):
    return ((x + m - 1) // m) * m


def _biasnet_kernel(x_ref, w1_ref, b1_ref, w2_ref, b2_ref, o_ref, *, apply_tanh):
    # Layer 1: (tm, nx) @ (nx, nh) on the MXU, f32 accumulation; hidden stays on-chip.
    h = jnp.dot(x_ref[...], w1_ref[...], preferred_element_type=jnp.float32)
    h = jnp.maximum(h + b1_ref[...], 0.0)
    # Layer 2: (tm, nh) @ (nh, tn) + bias (+ optional tanh on the EUP).
    y = jnp.dot(h, w2_ref[...], preferred_element_type=jnp.float32) + b2_ref[...]
    if apply_tanh:
        y = jnp.tanh(y)
    o_ref[...] = y


def biasnet_forward(x, w1_t, b1, w2_t, b2, visible_unit_type="bernoulli",
                    *, tm_target=128, tn_target=256):
    """
    Args:
      x    : (B, nx)  float32
      w1_t : (nx, nh) float32   (transposed PyTorch Linear 1 weight, nh == 32)
      b1   : (nh,)    float32
      w2_t : (nh, ny) float32   (transposed PyTorch Linear 2 weight)
      b2   : (ny,)    float32
    Returns:
      (B, ny) float32
    """
    B, nx = x.shape
    nh = w1_t.shape[1]
    ny = w2_t.shape[1]
    assert w1_t.shape == (nx, nh)
    assert w2_t.shape == (nh, ny)
    assert b1.shape == (nh,) and b2.shape == (ny,)
    apply_tanh = (visible_unit_type == "ising")

    # Row tile: multiple of 8 (sublane). Column tile: multiple of 128 (lane-dense stores).
    tm = min(tm_target, _round_up(B, 8))
    tn = min(tn_target, _round_up(ny, 128))
    B_p = _round_up(B, tm)
    ny_p = _round_up(ny, tn)

    # Pad once in the wrapper so every block divides exactly (no partial-tile hazards).
    x_p = x if B_p == B else jnp.pad(x, ((0, B_p - B), (0, 0)))
    w2_p = w2_t if ny_p == ny else jnp.pad(w2_t, ((0, 0), (0, ny_p - ny)))
    b2_p = b2 if ny_p == ny else jnp.pad(b2, (0, ny_p - ny))

    b1_2d = b1.reshape(1, nh)
    b2_2d = b2_p.reshape(1, ny_p)

    grid = (B_p // tm, ny_p // tn)

    cost = pl.CostEstimate(
        flops=2 * B * nx * nh + 2 * B * nh * ny,
        transcendentals=(B * ny) if apply_tanh else 0,
        bytes_accessed=4 * (B * nx + nx * nh + nh + nh * ny + ny + B * ny),
    )

    out_p = pl.pallas_call(
        functools.partial(_biasnet_kernel, apply_tanh=apply_tanh),
        out_shape=jax.ShapeDtypeStruct((B_p, ny_p), jnp.float32),
        grid_spec=pl.GridSpec(
            grid=grid,
            in_specs=[
                pl.BlockSpec((tm, nx), lambda i, j: (i, 0)),   # x row tile
                pl.BlockSpec((nx, nh), lambda i, j: (0, 0)),   # W1 (small, resident)
                pl.BlockSpec((1, nh), lambda i, j: (0, 0)),    # b1
                pl.BlockSpec((nh, tn), lambda i, j: (0, j)),   # W2 column tile (streamed)
                pl.BlockSpec((1, tn), lambda i, j: (0, j)),    # b2 column tile
            ],
            out_specs=pl.BlockSpec((tm, tn), lambda i, j: (i, j)),
        ),
        compiler_params=pltpu.CompilerParams(
            dimension_semantics=("parallel", "parallel"),
        ),
        cost_estimate=cost,
    )(x_p, w1_t, b1_2d, w2_p, b2_2d)

    return out_p[:B, :ny]


def init_biasnet_params(key, nx, ny, nh=32):
    """Deterministic init mimicking nn.Linear default: U(-1/sqrt(fan_in), 1/sqrt(fan_in))."""
    k1w, k1b, k2w, k2b = jax.random.split(key, 4)
    bound1 = 1.0 / math.sqrt(nx)
    # PyTorch stores weight as (out, in); we keep the transposed (in, out) layout.
    w1_t = jax.random.uniform(k1w, (nx, nh), jnp.float32, -bound1, bound1)
    b1 = jax.random.uniform(k1b, (nh,), jnp.float32, -bound1, bound1)
    bound2 = 1.0 / math.sqrt(nh)
    w2_t = jax.random.uniform(k2w, (nh, ny), jnp.float32, -bound2, bound2)
    b2 = jax.random.uniform(k2b, (ny,), jnp.float32, -bound2, bound2)
    return w1_t, b1, w2_t, b2


if __name__ == "__main__":
    # Small shapes consistent with the module's forward: x ~ (batch, nx) -> (batch, ny)
    batch, nx, ny = 4, 16, 8

    key = jax.random.PRNGKey(0)
    kx, kp = jax.random.split(key)
    x = jax.random.normal(kx, (batch, nx), jnp.float32)
    w1_t, b1, w2_t, b2 = init_biasnet_params(kp, nx, ny)

    ok = True
    for vtype in ("bernoulli", "ising"):
        out = biasnet_forward(x, w1_t, b1, w2_t, b2, vtype)
        out = jax.block_until_ready(out)

        # Pure-JAX reference of the same semantics.
        h = jnp.maximum(x @ w1_t + b1, 0.0)
        ref = h @ w2_t + b2
        if vtype == "ising":
            ref = jnp.tanh(ref)

        ok = ok and (out.shape == (batch, ny))
        ok = ok and bool(jnp.allclose(out, ref, atol=1e-5, rtol=1e-5))

    assert ok
    print("KERNEL_OK")
</pallas_src>

<mosaic_0001>
module attributes {stable_mosaic.version = 11 : i64} {
  func.func @_biasnet_kernel(%arg0: i32, %arg1: i32, %arg2: memref<8x16xf32, #tpu.memory_space<vmem>>, %arg3: memref<16x32xf32, #tpu.memory_space<vmem>>, %arg4: memref<1x32xf32, #tpu.memory_space<vmem>>, %arg5: memref<32x128xf32, #tpu.memory_space<vmem>>, %arg6: memref<1x128xf32, #tpu.memory_space<vmem>>, %arg7: memref<8x128xf32, #tpu.memory_space<vmem>>) attributes {dimension_semantics = [#tpu.dimension_semantics<parallel>, #tpu.dimension_semantics<parallel>], iteration_bounds = array<i64: 1, 1>, scalar_prefetch = 0 : i64, scratch_operands = 0 : i64, tpu.core_type = #tpu.core_type<tc>, window_params = [{transform_indices = @transform_0, window_bounds = array<i64: 8, 16>}, {pipeline_mode = #tpu.pipeline_mode<synchronous>, transform_indices = @transform_1, window_bounds = array<i64: 16, 32>}, {pipeline_mode = #tpu.pipeline_mode<synchronous>, transform_indices = @transform_2, window_bounds = array<i64: 1, 32>}, {transform_indices = @transform_3, window_bounds = array<i64: 32, 128>}, {transform_indices = @transform_4, window_bounds = array<i64: 1, 128>}, {transform_indices = @transform_5, window_bounds = array<i64: 8, 128>}]} {
    %c0 = arith.constant 0 : index
    %c0_0 = arith.constant 0 : index
    %0 = vector.load %arg2[%c0, %c0_0] : memref<8x16xf32, #tpu.memory_space<vmem>>, vector<8x16xf32>
    %c0_1 = arith.constant 0 : index
    %c0_2 = arith.constant 0 : index
    %1 = vector.load %arg3[%c0_1, %c0_2] : memref<16x32xf32, #tpu.memory_space<vmem>>, vector<16x32xf32>
    %cst = arith.constant dense<0.000000e+00> : vector<8x32xf32>
    %2 = tpu.matmul %0, %1, %cst {dimension_numbers = #tpu.dot_dimension_numbers<[1], [0], [0], [1], [0, 0, 1, 1], [], []>} : vector<8x16xf32>, vector<16x32xf32>, vector<8x32xf32> -> vector<8x32xf32>
    %c0_3 = arith.constant 0 : index
    %c0_4 = arith.constant 0 : index
    %3 = vector.load %arg4[%c0_3, %c0_4] : memref<1x32xf32, #tpu.memory_space<vmem>>, vector<1x32xf32>
    %4 = vector.broadcast %3 : vector<1x32xf32> to vector<8x32xf32>
    %5 = arith.addf %2, %4 : vector<8x32xf32>
    %cst_5 = arith.constant 0.000000e+00 : f32
    %6 = vector.broadcast %cst_5 : f32 to vector<8x32xf32>
    %7 = arith.maximumf %5, %6 : vector<8x32xf32>
    %c0_6 = arith.constant 0 : index
    %c0_7 = arith.constant 0 : index
    %8 = vector.load %arg5[%c0_6, %c0_7] : memref<32x128xf32, #tpu.memory_space<vmem>>, vector<32x128xf32>
    %cst_8 = arith.constant dense<0.000000e+00> : vector<8x128xf32>
    %9 = tpu.matmul %7, %8, %cst_8 {dimension_numbers = #tpu.dot_dimension_numbers<[1], [0], [0], [1], [0, 0, 1, 1], [], []>} : vector<8x32xf32>, vector<32x128xf32>, vector<8x128xf32> -> vector<8x128xf32>
    %c0_9 = arith.constant 0 : index
    %c0_10 = arith.constant 0 : index
    %10 = vector.load %arg6[%c0_9, %c0_10] : memref<1x128xf32, #tpu.memory_space<vmem>>, vector<1x128xf32>
    %11 = vector.broadcast %10 : vector<1x128xf32> to vector<8x128xf32>
    %12 = arith.addf %9, %11 : vector<8x128xf32>
    %c0_11 = arith.constant 0 : index
    %c0_12 = arith.constant 0 : index
    %13 = vector.load %arg7[%c0_11, %c0_12] : memref<8x128xf32, #tpu.memory_space<vmem>>, vector<8x128xf32>
    tpu.vector_store %arg7[%c0_11, %c0_12], %12 {strides = array<i32>} : memref<8x128xf32, #tpu.memory_space<vmem>>, vector<8x128xf32>,
    return
  }
  func.func @transform_0(%arg0: i32, %arg1: i32) -> (i32, i32) {
    %c0_i32 = arith.constant 0 : i32
    %c0_i32_0 = arith.constant 0 : i32
    return %arg0, %c0_i32 : i32, i32
  }
  func.func @transform_1(%arg0: i32, %arg1: i32) -> (i32, i32) {
    %c0_i32 = arith.constant 0 : i32
    %c0_i32_0 = arith.constant 0 : i32
    %c0_i32_1 = arith.constant 0 : i32
    return %c0_i32, %c0_i32_0 : i32, i32
  }
  func.func @transform_2(%arg0: i32, %arg1: i32) -> (i32, i32) {
    %c0_i32 = arith.constant 0 : i32
    %c0_i32_0 = arith.constant 0 : i32
    %c0_i32_1 = arith.constant 0 : i32
    return %c0_i32, %c0_i32_0 : i32, i32
  }
  func.func @transform_3(%arg0: i32, %arg1: i32) -> (i32, i32) {
    %c0_i32 = arith.constant 0 : i32
    %c0_i32_0 = arith.constant 0 : i32
    return %c0_i32, %arg1 : i32, i32
  }
  func.func @transform_4(%arg0: i32, %arg1: i32) -> (i32, i32) {
    %c0_i32 = arith.constant 0 : i32
    %c0_i32_0 = arith.constant 0 : i32
    return %c0_i32, %arg1 : i32, i32
  }
  func.func @transform_5(%arg0: i32, %arg1: i32) -> (i32, i32) {
    %c0_i32 = arith.constant 0 : i32
    return %arg0, %arg1 : i32, i32
  }
}

</mosaic_0001>

<bundles_post_ra>
// kernel: tpu_custom_call.1
= control target key start
LH: loop header
LB: loop body
LE: loop exit
PB: predicated region body
PF: predicated region fallthrough
CT: control target
= control target key end

     0   :  { %10 = vsyncpa [#allocation3], 0  ;;  %s427_s0 = inlined_call_operand.hbm [shape: f32[8,16], index: 0, kind: input, shape index: {}]   ;;  %s428_s1 = inlined_call_operand.hbm [shape: f32[16,32], index: 1, kind: input, shape index: {}]   ;;  %s429_s2 = inlined_call_operand.vmem [shape: f32[1,32], index: 2, kind: input, shape index: {}]   ;;  %s430_s3 = inlined_call_operand.hbm [shape: f32[32,128], index: 3, kind: input, shape index: {}]   ;;  %s431_s4 = inlined_call_operand.vmem [shape: f32[1,128], index: 4, kind: input, shape index: {}]   ;;  %s432_s5 = inlined_call_operand.hbm [shape: f32[8,128], index: 5, kind: output, shape index: {}]  }
   0x1   :  { %11 = vsyncpa [#allocation6], 0 }
   0x2   :  { %12 = vsyncpa [#allocation4], 0  ;;  %s371_s18 = smov [#allocation5]  }
   0x3   :  { %s28_s19 = sshll.u32 %s371_s18, 4  ;;  %s29_s19 = int_to_ptr.vmem [resolvable:$true] %s28_s19 }
   0x4   :  { %s293_s20 = scalar_lea.vmem %s29_s19, 256  ;;  %p298_p1 = scmp.lt.s32.totalorder %s29_s19, %s29_s19 }
   0x5   :  { %p294_p0 = scmp.ne.s32.totalorder %s29_s19, %s293_s20  ;;  %p299_p2 = scmp.lt.s32.totalorder %s293_s20, %s293_s20 }
   0x7   :  { %p300_p3 = por %p299_p2, %p298_p1 }
   0x9   :  { %p301_p4 = pnand %p300_p3, %p294_p0 }
   0xb   :  { %304 = shalt.err (!%p301_p4)
}
   0xc   :  { %s372_s21 = smov 128   ;;  %s373_s22 = smov 8  }
   0xd   :  { %34 = dma.hbm_to_vmem [thread:$0]  %s428_s1, 256, %s29_s19, [#allocation6], %s372_s21, %s372_s21, %s373_s22  }
   0xe   :  { %s374_s25 = smov [#allocation2]   ;;  %s375_s27 = smov [#allocation7]  }
   0xf   :  { %s19_s26 = sshll.u32 %s374_s25, 4  ;;  %s42_s28 = sshll.u32 %s375_s27, 4  ;;  %s20_s26 = int_to_ptr.vmem [resolvable:$true] %s19_s26  ;;  %s43_s28 = int_to_ptr.vmem [resolvable:$true] %s42_s28 }
  0x10   :  { %s313_s29 = scalar_lea.vmem %s20_s26, 128  ;;  %p318_p6 = scmp.lt.s32.totalorder %s20_s26, %s20_s26 }
  0x11   :  { %p314_p5 = scmp.ne.s32.totalorder %s20_s26, %s313_s29  ;;  %p319_p7 = scmp.lt.s32.totalorder %s313_s29, %s313_s29 }
  0x13   :  { %p320_p8 = por %p319_p7, %p318_p6 }
  0x15   :  { %p321_p9 = pnand %p320_p8, %p314_p5 }
  0x17   :  { %324 = shalt.err (!%p321_p9)
}
  0x18   :  { %22 = dma.hbm_to_vmem [thread:$0]  %s427_s0, 128, %s20_s26, [#allocation3]  }
  0x19   :  { %s333_s7 = scalar_lea.vmem %s43_s28, 512  ;;  %p338_p11 = scmp.lt.s32.totalorder %s43_s28, %s43_s28 }
  0x1a   :  { %p334_p10 = scmp.ne.s32.totalorder %s43_s28, %s333_s7  ;;  %p339_p12 = scmp.lt.s32.totalorder %s333_s7, %s333_s7 }
  0x1c   :  { %p340_p13 = por %p339_p12, %p338_p11 }
  0x1e   :  { %p341_p0 = pnand %p340_p13, %p334_p10 }
  0x20   :  { %344 = shalt.err (!%p341_p0)
}
  0x21   :  { %48 = dma.hbm_to_vmem [thread:$0]  %s430_s3, 512, %s43_s28, [#allocation6], %s372_s21, %s372_s21, %s373_s22  }
  0x22   :  { %365 = dma.done.wait [#allocation3], 128  }
  0x23   :  { %366 = vsyncadd [#allocation3], 4294967168 }
  0x24   :  { %367 = dma.done.wait [#allocation6], 768  }
  0x25   :  { %368 = vsyncadd [#allocation6], 4294966528  ;;  %v376_v0 = vmov 0.0   ;;  %vm377_vm0 = vmmov 0   ;;  %v62_v1 = vld [vmem:[#allocation5 + $0x8] sm:$0xff]  ;;  %v61_v2 = vld [vmem:[#allocation5] sm:$0xff] }
  0x26   :  { %259 = vmatprep.subr.mxu0 %v376_v0  ;;  %263 = vmatprep.mubr.msk.f32.mxu0 %vm377_vm0, %v376_v0  ;;  %v60_v3 = vld [vmem:[#allocation2] sm:$0xff]  ;;  %vm70_vm1 = vcmask 130048   ;;  %v148_v4 = vld [vmem:[#allocation7 + $0x18] sm:$0xff]  ;;  %v147_v5 = vld [vmem:[#allocation7 + $0x10] sm:$0xff]  ;;  %vm156_vm2 = vcmask 261120   ;;  %s378_s11 = smov [#allocation8]  }
  0x27   :  { %266 = vmatprep.subr.mxu1 %v376_v0  ;;  %274 = vmatprep.mubr.msk.f32.mxu1 %vm377_vm0, %v376_v0  ;;  %v146_v6 = vld [vmem:[#allocation7 + $0x8] sm:$0xff]  ;;  %v145_v7 = vld [vmem:[#allocation7] sm:$0xff]  ;;  %s237_s12 = sshll.u32 %s378_s11, 4  ;;  %s238_s12 = int_to_ptr.vmem [resolvable:$true] %s237_s12 }
  0x28   :  { %260 = vmatpush3.msra.mxu0 %v62_v1  ;;  %267 = vmatpush3.msra.mxu1 %v148_v4  ;;  %v247_v8 = vld [vmem:[%s429_s2] ss:$0 sm:$0xff]  ;;  %s345_s13 = scalar_lea.vmem %s238_s12, 128  ;;  %p350_p2 = scmp.lt.s32.totalorder %s238_s12, %s238_s12 }
  0x29   :  { %261 = vmatprep.subr.mxu0 %v376_v0  ;;  %268 = vmatprep.subr.mxu1 %v376_v0  ;;  %v249_v13 = vld [vmem:[%s431_s4] ss:$0 sm:$0xff]  ;;  %p346_p1 = scmp.ne.s32.totalorder %s238_s12, %s345_s13  ;;  %p351_p3 = scmp.lt.s32.totalorder %s345_s13, %s345_s13 }
  0x2a   :  { %262 = vmatpush3.msra.mxu0 %v61_v2  ;;  %269 = vmatpush3.msra.mxu1 %v147_v5 }
  0x2b   :  { %264 = vmatmul.mubr.msk.f32.vlgmr.msra.gmra.mxu0 %vm70_vm1, %v60_v3  ;;  %270 = vmatprep.subr.mxu1 %v376_v0  ;;  %p352_p4 = por %p351_p3, %p350_p2 }
  0x2c   :  { %271 = vmatpush3.msra.mxu1 %v146_v6 }
  0x2d   :  { %272 = vmatprep.subr.mxu1 %v376_v0  ;;  %p353_p5 = pnand %p352_p4, %p346_p1 }
  0x2e   :  { %273 = vmatpush3.msra.mxu1 %v145_v7 }
  0xeb   :  { %v140_v9 = vpop.f32.mrf.mxu0 }
  0xec   :  { %v141_v10 = vadd.f32 %v247_v8, %v140_v9 }
  0xed   :  { %v265_v11 = vpop.f32.mrf.mxu0 }
  0xee   :  { %v144_v12 = vmax.f32 %v141_v10, 0.0 }
  0xf0   :  { %275 = vmatmul.mubr.msk.f32.vlgmr.msra.gmra.mxu1 %vm156_vm2, %v144_v12 }
 0x1b0   :  { %v226_v14 = vpop.f32.mrf.mxu1 }
 0x1b1   :  { %v227_v15 = vadd.f32 %v249_v13, %v226_v14 }
 0x1b2   :  { %v276_v16 = vpop.f32.mrf.mxu1 }
 0x1b3   :  { %230 = vst [vmem:[#allocation8] sm:$0xff] %v227_v15 }
 0x1b4   :  { %356 = shalt.err (!%p353_p5)
}
 0x1b5   :  { %240 = dma.vmem_to_hbm [thread:$0]  %s238_s12, 128, %s432_s5, [#allocation4]  }
 0x1b6   :  { %369 = dma.done.wait [#allocation4], 128  }
 0x1b7   :  { %370 = vsyncadd [#allocation4], 4294967168 }
 0x1b8   :  { %244 = vsyncpa [#allocation3], 1 }
 0x1b9   :  { %245 = vsyncpa [#allocation6], 1 }
 0x1ba   :  { %246 = vsyncpa [#allocation4], 1 }

</bundles_post_ra>
